<compile_context>
chip_gen: v7x
topology: tpu7x:2x2x1
jax: 0.10.0
libtpu: 0.0.40
codegen_flags: <defaults>
</compile_context>

<pallas_src>
import functools

import jax
import jax.numpy as jnp
from jax.experimental import pallas as pl
from jax.experimental.pallas import tpu as pltpu

EPS = 1e-5
_MiB = 1024 * 1024


# --------------------------- VMEM / tile budgets ------------------------------
@functools.lru_cache(maxsize=1)
def _vmem_limit_bytes():
    """Generation-aware scoped-VMEM limit (v7x: ~48 MiB, v5e/v6e: ~100 MiB)."""
    try:
        cap = int(pltpu.get_tpu_info().vmem_capacity_bytes)
    except Exception:
        cap = 64 * _MiB                      # conservative (v7x-sized) fallback
    return int(min(max(cap - 16 * _MiB, 32 * _MiB), 100 * _MiB))


def _budgets():
    lim = _vmem_limit_bytes()
    return dict(
        limit=lim,
        stats=min(lim // 8, 8 * _MiB),   # 2x in (double-buffered) + 2x f32 acc
        apply=min(lim // 6, 12 * _MiB),  # 2x in + 2x out
        fused=min(lim // 8, 6 * _MiB),   # 2x in + 2x out + f32 temporaries
    )


def _pick_tiles(R, Lp, itemsize, budget):
    """(row_tile, lane_tile) for a (R, Lp) slab. Lane tile = multiple of 128
    dividing Lp; row tile = multiple of 8 dividing R (or R itself if R % 8)."""
    base_tr = 8 if R % 8 == 0 else R
    tl = max(128, (budget // max(1, base_tr * itemsize)) // 128 * 128)
    tl = min(Lp, tl)
    while Lp % tl:
        tl -= 128
    if R % 8 == 0:
        tr = max(8, (budget // max(1, tl * itemsize)) // 8 * 8)
        tr = min(R, tr)
        while R % tr:
            tr -= 8
    else:
        tr = R                               # full second-to-last dim is legal
    return tr, tl


def _pick_fused_rows(R, Lp, itemsize, budget):
    """Row tile for the fused inorm path, or None if a row-block is too big."""
    base_tr = 8 if R % 8 == 0 else R
    if base_tr * Lp * itemsize > budget:
        return None
    if R % 8:
        return R
    tr = min(R, max(8, (budget // max(1, Lp * itemsize)) // 8 * 8))
    while R % tr:
        tr -= 8
    return tr


# ----------------------------- layout helpers ---------------------------------
def _prep(x):
    N, C, H, W = x.shape
    L = H * W
    x2 = x.reshape(N * C, L)                 # free reshape, lane dim = spatial
    Lp = ((L + 127) // 128) * 128            # pad lanes to a multiple of 128
    if Lp != L:
        x2 = jnp.pad(x2, ((0, 0), (0, Lp - L)))
    return x2, L, Lp


def _unprep(y2, N, C, H, W, L, Lp):
    if Lp != L:
        y2 = y2[:, :L]
    return y2.reshape(N, C, H, W)


# ------------------------------- stats pass -----------------------------------
def _stats_kernel(x_ref, sum_ref, sq_ref, acc_s, acc_q):
    l = pl.program_id(1)

    @pl.when(l == 0)
    def _():
        acc_s[...] = jnp.zeros_like(acc_s)
        acc_q[...] = jnp.zeros_like(acc_q)

    x = x_ref[...].astype(jnp.float32)           # (TR, TL)
    acc_s[...] += x                              # pure VPU adds per step
    acc_q[...] += x * x                          # (no per-step XLU reduce)

    @pl.when(l == pl.num_programs(1) - 1)
    def _():
        # single cross-lane reduce + narrow store per row tile
        sum_ref[...] = jnp.sum(acc_s[...], axis=-1, keepdims=True)
        sq_ref[...] = jnp.sum(acc_q[...], axis=-1, keepdims=True)


def _row_stats(x2, tr, tl):
    R, Lp = x2.shape
    nr, nl = R // tr, Lp // tl
    return pl.pallas_call(
        _stats_kernel,
        out_shape=(jax.ShapeDtypeStruct((R, 1), jnp.float32),
                   jax.ShapeDtypeStruct((R, 1), jnp.float32)),
        grid_spec=pltpu.PrefetchScalarGridSpec(
            num_scalar_prefetch=0,
            grid=(nr, nl),
            in_specs=[pl.BlockSpec((tr, tl), lambda r, l: (r, l))],
            out_specs=(pl.BlockSpec((tr, 1), lambda r, l: (r, 0)),
                       pl.BlockSpec((tr, 1), lambda r, l: (r, 0))),
            scratch_shapes=[pltpu.VMEM((tr, tl), jnp.float32),
                            pltpu.VMEM((tr, tl), jnp.float32)]),
        compiler_params=pltpu.CompilerParams(
            # Row axis emits only per-row partials -> safe to mark "parallel",
            # so the bnorm stats pass uses both v7x TensorCores.
            dimension_semantics=("parallel", "arbitrary"),
            vmem_limit_bytes=_vmem_limit_bytes()),
        cost_estimate=pl.CostEstimate(
            flops=3 * R * Lp, transcendentals=0,
            bytes_accessed=R * Lp * x2.dtype.itemsize + 8 * R),
    )(x2)


def _fold_affine(sums, sqs, weight, bias, N, C, L, per_sample):
    """Tiny per-row math in JAX: fold mean/var/weight/bias into per-row
    scale/shift so the apply pass is one mul + one add per element."""
    w = weight.astype(jnp.float32)
    b = bias.astype(jnp.float32)
    if per_sample:                           # inorm: stats per (n, c) row
        cnt = float(L)
        mean = sums / cnt
        var = sqs / cnt - mean * mean
    else:                                    # bnorm: combine partials across N
        cnt = float(N * L)
        s_c = jnp.sum(sums.reshape(N, C), axis=0)
        q_c = jnp.sum(sqs.reshape(N, C), axis=0)
        mean_c = s_c / cnt
        var_c = q_c / cnt - mean_c * mean_c
        mean = jnp.tile(mean_c, N).reshape(N * C, 1)
        var = jnp.tile(var_c, N).reshape(N * C, 1)
    var = jnp.maximum(var, 0.0)              # guard E[x^2]-mean^2 cancellation
    w_r = jnp.tile(w, N).reshape(N * C, 1)
    b_r = jnp.tile(b, N).reshape(N * C, 1)
    scale = jax.lax.rsqrt(var + EPS) * w_r
    shift = b_r - mean * scale
    return scale, shift


# ------------------------------- apply pass -----------------------------------
def _apply_kernel(x_ref, scale_ref, shift_ref, o_ref):
    x = x_ref[...].astype(jnp.float32)
    o_ref[...] = (x * scale_ref[...] + shift_ref[...]).astype(o_ref.dtype)


def _row_apply(x2, scale, shift, tr, tl):
    R, Lp = x2.shape
    nr, nl = R // tr, Lp // tl
    return pl.pallas_call(
        _apply_kernel,
        out_shape=jax.ShapeDtypeStruct((R, Lp), x2.dtype),
        grid_spec=pltpu.PrefetchScalarGridSpec(
            num_scalar_prefetch=0,
            grid=(nr, nl),
            in_specs=[pl.BlockSpec((tr, tl), lambda r, l: (r, l)),
                      pl.BlockSpec((tr, 1), lambda r, l: (r, 0)),
                      pl.BlockSpec((tr, 1), lambda r, l: (r, 0))],
            out_specs=pl.BlockSpec((tr, tl), lambda r, l: (r, l))),
        compiler_params=pltpu.CompilerParams(
            dimension_semantics=("parallel", "parallel"),
            vmem_limit_bytes=_vmem_limit_bytes()),
        cost_estimate=pl.CostEstimate(
            flops=2 * R * Lp, transcendentals=0,
            bytes_accessed=2 * R * Lp * x2.dtype.itemsize),
    )(x2, scale, shift)


# --------------------------- fused inorm (1 pass) ------------------------------
def _fused_inorm_kernel(x_ref, w_ref, b_ref, o_ref, *, inv_count):
    x = x_ref[...].astype(jnp.float32)                 # (TR, Lp)
    s = jnp.sum(x, axis=-1, keepdims=True)
    q = jnp.sum(x * x, axis=-1, keepdims=True)
    mean = s * inv_count
    var = jnp.maximum(q * inv_count - mean * mean, 0.0)
    scale = jax.lax.rsqrt(var + EPS) * w_ref[...]
    shift = b_ref[...] - mean * scale
    o_ref[...] = (x * scale + shift).astype(o_ref.dtype)


def _fused_inorm(x2, w_r, b_r, tr, L):
    R, Lp = x2.shape
    kern = functools.partial(_fused_inorm_kernel, inv_count=1.0 / L)
    return pl.pallas_call(
        kern,
        out_shape=jax.ShapeDtypeStruct((R, Lp), x2.dtype),
        grid_spec=pltpu.PrefetchScalarGridSpec(
            num_scalar_prefetch=0,
            grid=(R // tr,),
            in_specs=[pl.BlockSpec((tr, Lp), lambda r: (r, 0)),
                      pl.BlockSpec((tr, 1), lambda r: (r, 0)),
                      pl.BlockSpec((tr, 1), lambda r: (r, 0))],
            out_specs=pl.BlockSpec((tr, Lp), lambda r: (r, 0))),
        compiler_params=pltpu.CompilerParams(
            dimension_semantics=("parallel",),
            vmem_limit_bytes=_vmem_limit_bytes()),
        cost_estimate=pl.CostEstimate(
            flops=5 * R * Lp, transcendentals=R,
            bytes_accessed=2 * R * Lp * x2.dtype.itemsize),
    )(x2, w_r, b_r)


# --------------------------------- Norm2d --------------------------------------
def batch_norm2d(x, weight, bias):
    """x: (N, C, H, W) NCHW. weight/bias: (C,). Training-mode BatchNorm2d."""
    N, C, H, W = x.shape
    x2, L, Lp = _prep(x)
    R = N * C
    bud = _budgets()
    itemsize = x2.dtype.itemsize

    tr_s, tl_s = _pick_tiles(R, Lp, itemsize, bud["stats"])
    sums, sqs = _row_stats(x2, tr_s, tl_s)
    scale, shift = _fold_affine(sums, sqs, weight, bias, N, C, L,
                                per_sample=False)
    tr_a, tl_a = _pick_tiles(R, Lp, itemsize, bud["apply"])
    y2 = _row_apply(x2, scale, shift, tr_a, tl_a)
    return _unprep(y2, N, C, H, W, L, Lp)


def instance_norm2d(x, weight, bias):
    """x: (N, C, H, W) NCHW. weight/bias: (C,). InstanceNorm2d(affine=True)."""
    N, C, H, W = x.shape
    x2, L, Lp = _prep(x)
    R = N * C
    bud = _budgets()
    itemsize = x2.dtype.itemsize

    tr_f = _pick_fused_rows(R, Lp, itemsize, bud["fused"])
    if tr_f is not None:
        # Single fused pass: read x once, write y once (2x HBM traffic).
        w_r = jnp.tile(weight.astype(jnp.float32), N).reshape(R, 1)
        b_r = jnp.tile(bias.astype(jnp.float32), N).reshape(R, 1)
        y2 = _fused_inorm(x2, w_r, b_r, tr_f, L)
    else:
        # Rows too long for VMEM residency: fall back to two tiled passes.
        tr_s, tl_s = _pick_tiles(R, Lp, itemsize, bud["stats"])
        sums, sqs = _row_stats(x2, tr_s, tl_s)
        scale, shift = _fold_affine(sums, sqs, weight, bias, N, C, L,
                                    per_sample=True)
        tr_a, tl_a = _pick_tiles(R, Lp, itemsize, bud["apply"])
        y2 = _row_apply(x2, scale, shift, tr_a, tl_a)
    return _unprep(y2, N, C, H, W, L, Lp)


def norm2d(x, weight, bias, norm_mode):
    if norm_mode == "bnorm":
        return batch_norm2d(x, weight, bias)
    if norm_mode == "inorm":
        return instance_norm2d(x, weight, bias)
    raise ValueError(norm_mode)


# -------------------------------- reference ------------------------------------
def _ref_bnorm(x, w, b):
    xf = x.astype(jnp.float32)
    mean = jnp.mean(xf, axis=(0, 2, 3), keepdims=True)
    var = jnp.mean((xf - mean) ** 2, axis=(0, 2, 3), keepdims=True)
    return ((xf - mean) * jax.lax.rsqrt(var + EPS)
            * w.reshape(1, -1, 1, 1) + b.reshape(1, -1, 1, 1)).astype(x.dtype)


def _ref_inorm(x, w, b):
    xf = x.astype(jnp.float32)
    mean = jnp.mean(xf, axis=(2, 3), keepdims=True)
    var = jnp.mean((xf - mean) ** 2, axis=(2, 3), keepdims=True)
    return ((xf - mean) * jax.lax.rsqrt(var + EPS)
            * w.reshape(1, -1, 1, 1) + b.reshape(1, -1, 1, 1)).astype(x.dtype)


if __name__ == "__main__":
    key = jax.random.PRNGKey(0)
    kx, kw, kb, kx2 = jax.random.split(key, 4)

    N, C, H, W = 2, 4, 16, 16            # small NCHW input, as in PyTorch
    x = jax.random.normal(kx, (N, C, H, W), dtype=jnp.float32)
    weight = 1.0 + 0.1 * jax.random.normal(kw, (C,), dtype=jnp.float32)
    bias = 0.1 * jax.random.normal(kb, (C,), dtype=jnp.float32)

    y_bn = jax.block_until_ready(norm2d(x, weight, bias, "bnorm"))
    y_in = jax.block_until_ready(norm2d(x, weight, bias, "inorm"))
    assert y_bn.shape == x.shape and y_in.shape == x.shape
    assert jnp.allclose(y_bn, _ref_bnorm(x, weight, bias), atol=2e-5, rtol=2e-5)
    assert jnp.allclose(y_in, _ref_inorm(x, weight, bias), atol=2e-5, rtol=2e-5)

    # Non-multiple-of-128 spatial size exercises the lane-padding path.
    x_odd = jax.random.normal(kx2, (N, C, 7, 7), dtype=jnp.float32)
    y_bn2 = jax.block_until_ready(norm2d(x_odd, weight, bias, "bnorm"))
    y_in2 = jax.block_until_ready(norm2d(x_odd, weight, bias, "inorm"))
    assert jnp.allclose(y_bn2, _ref_bnorm(x_odd, weight, bias),
                        atol=2e-5, rtol=2e-5)
    assert jnp.allclose(y_in2, _ref_inorm(x_odd, weight, bias),
                        atol=2e-5, rtol=2e-5)

    print("KERNEL_OK")
</pallas_src>

<mosaic_0001>
module attributes {stable_mosaic.version = 11 : i64} {
  func.func @_stats_kernel(%arg0: i32, %arg1: i32, %arg2: memref<8x256xf32, #tpu.memory_space<vmem>>, %arg3: memref<8x1xf32, #tpu.memory_space<vmem>>, %arg4: memref<8x1xf32, #tpu.memory_space<vmem>>, %arg5: memref<8x256xf32, #tpu.memory_space<vmem>>, %arg6: memref<8x256xf32, #tpu.memory_space<vmem>>) attributes {dimension_semantics = [#tpu.dimension_semantics<parallel>, #tpu.dimension_semantics<arbitrary>], iteration_bounds = array<i64: 1, 1>, scalar_prefetch = 0 : i64, scratch_operands = 2 : i64, tpu.core_type = #tpu.core_type<tc>, window_params = [{transform_indices = @transform_0, window_bounds = array<i64: 8, 256>}, {transform_indices = @transform_1, window_bounds = array<i64: 8, 1>}, {transform_indices = @transform_2, window_bounds = array<i64: 8, 1>}]} {
    %c0_i32 = arith.constant 0 : i32
    %0 = arith.cmpi eq, %arg1, %c0_i32 : i32
    %1 = arith.extui %0 : i1 to i32
    %c0_i32_0 = arith.constant 0 : i32
    %2 = arith.cmpi ne, %1, %c0_i32_0 : i32
    scf.if %2 {
      %cst = arith.constant 0.000000e+00 : f32
      %14 = vector.broadcast %cst : f32 to vector<8x256xf32>
      %c0_12 = arith.constant 0 : index
      %c0_13 = arith.constant 0 : index
      %15 = vector.load %arg5[%c0_12, %c0_13] : memref<8x256xf32, #tpu.memory_space<vmem>>, vector<8x256xf32>
      tpu.vector_store %arg5[%c0_12, %c0_13], %14 {strides = array<i32>} : memref<8x256xf32, #tpu.memory_space<vmem>>, vector<8x256xf32>,
      %cst_14 = arith.constant 0.000000e+00 : f32
      %16 = vector.broadcast %cst_14 : f32 to vector<8x256xf32>
      %c0_15 = arith.constant 0 : index
      %c0_16 = arith.constant 0 : index
      %17 = vector.load %arg6[%c0_15, %c0_16] : memref<8x256xf32, #tpu.memory_space<vmem>>, vector<8x256xf32>
      tpu.vector_store %arg6[%c0_15, %c0_16], %16 {strides = array<i32>} : memref<8x256xf32, #tpu.memory_space<vmem>>, vector<8x256xf32>,
    } else {
    }
    %c0 = arith.constant 0 : index
    %c0_1 = arith.constant 0 : index
    %3 = vector.load %arg2[%c0, %c0_1] : memref<8x256xf32, #tpu.memory_space<vmem>>, vector<8x256xf32>
    %c0_2 = arith.constant 0 : index
    %c0_3 = arith.constant 0 : index
    %4 = vector.load %arg5[%c0_2, %c0_3] : memref<8x256xf32, #tpu.memory_space<vmem>>, vector<8x256xf32>
    %5 = arith.addf %4, %3 : vector<8x256xf32>
    %c0_4 = arith.constant 0 : index
    %c0_5 = arith.constant 0 : index
    %6 = vector.load %arg5[%c0_4, %c0_5] : memref<8x256xf32, #tpu.memory_space<vmem>>, vector<8x256xf32>
    tpu.vector_store %arg5[%c0_4, %c0_5], %5 {strides = array<i32>} : memref<8x256xf32, #tpu.memory_space<vmem>>, vector<8x256xf32>,
    %c0_6 = arith.constant 0 : index
    %c0_7 = arith.constant 0 : index
    %7 = vector.load %arg6[%c0_6, %c0_7] : memref<8x256xf32, #tpu.memory_space<vmem>>, vector<8x256xf32>
    %8 = arith.mulf %3, %3 : vector<8x256xf32>
    %9 = arith.addf %7, %8 : vector<8x256xf32>
    %c0_8 = arith.constant 0 : index
    %c0_9 = arith.constant 0 : index
    %10 = vector.load %arg6[%c0_8, %c0_9] : memref<8x256xf32, #tpu.memory_space<vmem>>, vector<8x256xf32>
    tpu.vector_store %arg6[%c0_8, %c0_9], %9 {strides = array<i32>} : memref<8x256xf32, #tpu.memory_space<vmem>>, vector<8x256xf32>,
    %c0_i32_10 = arith.constant 0 : i32
    %11 = arith.cmpi eq, %arg1, %c0_i32_10 : i32
    %12 = arith.extui %11 : i1 to i32
    %c0_i32_11 = arith.constant 0 : i32
    %13 = arith.cmpi ne, %12, %c0_i32_11 : i32
    scf.if %13 {
      %c0_12 = arith.constant 0 : index
      %c0_13 = arith.constant 0 : index
      %14 = vector.load %arg5[%c0_12, %c0_13] : memref<8x256xf32, #tpu.memory_space<vmem>>, vector<8x256xf32>
      %cst = arith.constant dense<0.000000e+00> : vector<8xf32>
      %15 = vector.multi_reduction <add>, %14, %cst [1] : vector<8x256xf32> to vector<8xf32>
      %16 = vector.shape_cast %15 : vector<8xf32> to vector<8x1xf32>
      %c0_14 = arith.constant 0 : index
      %c0_15 = arith.constant 0 : index
      %17 = vector.load %arg3[%c0_14, %c0_15] : memref<8x1xf32, #tpu.memory_space<vmem>>, vector<8x1xf32>
      tpu.vector_store %arg3[%c0_14, %c0_15], %16 {strides = array<i32>} : memref<8x1xf32, #tpu.memory_space<vmem>>, vector<8x1xf32>,
      %c0_16 = arith.constant 0 : index
      %c0_17 = arith.constant 0 : index
      %18 = vector.load %arg6[%c0_16, %c0_17] : memref<8x256xf32, #tpu.memory_space<vmem>>, vector<8x256xf32>
      %cst_18 = arith.constant dense<0.000000e+00> : vector<8xf32>
      %19 = vector.multi_reduction <add>, %18, %cst_18 [1] : vector<8x256xf32> to vector<8xf32>
      %20 = vector.shape_cast %19 : vector<8xf32> to vector<8x1xf32>
      %c0_19 = arith.constant 0 : index
      %c0_20 = arith.constant 0 : index
      %21 = vector.load %arg4[%c0_19, %c0_20] : memref<8x1xf32, #tpu.memory_space<vmem>>, vector<8x1xf32>
      tpu.vector_store %arg4[%c0_19, %c0_20], %20 {strides = array<i32>} : memref<8x1xf32, #tpu.memory_space<vmem>>, vector<8x1xf32>,
    } else {
    }
    return
  }
  func.func @transform_0(%arg0: i32, %arg1: i32) -> (i32, i32) {
    %c0_i32 = arith.constant 0 : i32
    return %arg0, %arg1 : i32, i32
  }
  func.func @transform_1(%arg0: i32, %arg1: i32) -> (i32, i32) {
    %c0_i32 = arith.constant 0 : i32
    %c0_i32_0 = arith.constant 0 : i32
    return %arg0, %c0_i32 : i32, i32
  }
  func.func @transform_2(%arg0: i32, %arg1: i32) -> (i32, i32) {
    %c0_i32 = arith.constant 0 : i32
    %c0_i32_0 = arith.constant 0 : i32
    return %arg0, %c0_i32 : i32, i32
  }
}

</mosaic_0001>

<bundles_post_ra>
// kernel: tpu_custom_call.1
= control target key start
LH: loop header
LB: loop body
LE: loop exit
PB: predicated region body
PF: predicated region fallthrough
CT: control target
= control target key end

     0   :  { %8 = vsyncpa [#allocation5], 0  ;;  %s96_s9 = smov [#allocation4]   ;;  %s130_s0 = inlined_call_operand.hbm [shape: f32[8,256], index: 0, kind: input, shape index: {}]   ;;  %s131_s1 = inlined_call_operand.vmem [shape: f32[8,1], index: 1, kind: output, shape index: {0}]   ;;  %s132_s2 = inlined_call_operand.vmem [shape: f32[8,1], index: 2, kind: output, shape index: {1}]  }
   0x1   :  { %s15_s10 = sshll.u32 %s96_s9, 4  ;;  %s72_s13 = scalar_lea.hbm %s130_s0, 256  ;;  %s16_s10 = int_to_ptr.vmem [resolvable:$true] %s15_s10 }
   0x2   :  { %p73_p0 = scmp.ne.s32.totalorder %s130_s0, %s72_s13  ;;  %p76_p1 = scmp.lt.u32.totalorder %s72_s13, %s130_s0 }
   0x4   :  { %p78_p2 = pnand %p76_p1, %p73_p0 }
   0x6   :  { %81 = shalt.err (!%p78_p2)
}
   0x7   :  { %s82_s18 = scalar_lea.vmem %s16_s10, 256  ;;  %p87_p4 = scmp.lt.s32.totalorder %s16_s10, %s16_s10 }
   0x8   :  { %p83_p3 = scmp.ne.s32.totalorder %s16_s10, %s82_s18  ;;  %p88_p5 = scmp.lt.s32.totalorder %s82_s18, %s82_s18 }
   0xa   :  { %p89_p6 = por %p88_p5, %p87_p4 }
   0xc   :  { %p90_p7 = pnand %p89_p6, %p83_p3 }
   0xe   :  { %93 = shalt.err (!%p90_p7)
}
   0xf   :  { %18 = dma.hbm_to_vmem [thread:$0]  %s130_s0, 256, %s16_s10, [#allocation5]  }
  0x10   :  { %94 = dma.done.wait [#allocation5], 256  }
  0x11   :  { %95 = vsyncadd [#allocation5], 4294967040  ;;  %v30_v0 = vld [vmem:[#allocation4] sm:$0xff]  ;;  %v31_v1 = vld [vmem:[#allocation4 + $0x8] sm:$0xff]  ;;  %vm54_vm0 = vcmask 7168  }
  0x12   :  { %v41_v2 = vmul.f32 %v31_v1, %v31_v1  ;;  %v51_v3 = vadd.f32 %v31_v1, %v30_v0  ;;  %v40_v4 = vmul.f32 %v30_v0, %v30_v0 }
  0x14   :  { %52 = vadd.xlane.f32.xlu0 %v51_v3  ;;  %v58_v5 = vadd.f32 %v41_v2, %v40_v4 }
  0x18   :  { %59 = vadd.xlane.f32.xlu0 %v58_v5 }
  0xa1   :  { %v53_v6 = vpop.xlane.xlu0 %52 }
  0xa2   :  { %55 = vst.msk [vmem:[%s131_s1] sm:$0xff] %vm54_vm0, %v53_v6 }
  0xa5   :  { %v60_v7 = vpop.xlane.xlu0 %59 }
  0xa6   :  { %61 = vst.msk [vmem:[%s132_s2] sm:$0xff] %vm54_vm0, %v60_v7 }
  0xa7   :  { %70 = vsyncpa [#allocation5], 1 }

</bundles_post_ra>
